<compile_context>
chip_gen: v7x
topology: tpu7x:2x2x1
jax: 0.10.0
libtpu: 0.0.40
codegen_flags: <defaults>
</compile_context>

<pallas_src>
import numpy as np

import jax
import jax.numpy as jnp
from jax.experimental import pallas as pl
from jax.experimental.pallas import tpu as pltpu

LANE = 128
SUB = 8


def _rup(n, m):
    return ((n + m - 1) // m) * m


def pack_params(params, *, batch, in_ch, length):
    """Pack all parameters + the constant pooling matrix into one f32 slab.

    One (Rslab, SW) array == one input DMA for every weight/constant.  Every
    region starts at an 8-row-aligned offset; every pad element is exactly
    zero so padded channels stay identically zero through BN and ReLU.
    Host-side numpy only; run ONCE, outside the per-call hot path.
    """
    wc, bc, w1, b1, gamma, beta, w2, b2 = (np.asarray(p, np.float32) for p in params)
    F, Cin, K = wc.shape
    assert Cin == in_ch
    H = w1.shape[1]
    P = w2.shape[1]
    B, L = batch, length
    Lout = L - K + 1
    R = B * L - (K - 1)          # rows of the in-kernel conv output (garbage rows masked)

    Fp, Hp, Pp = _rup(F, LANE), _rup(H, LANE), _rup(P, LANE)
    SW = max(Fp, Hp, Pp, _rup(R, LANE))

    off = {}
    cursor = 0

    def alloc(name, rows):
        nonlocal cursor
        off[name] = cursor
        cursor += _rup(rows, SUB)

    for k in range(K):
        alloc(f"wc{k}", Cin)
    alloc("pool", B)
    for name in ("bc", "b1", "gamma", "beta", "b2"):
        alloc(name, 1)
    alloc("w1", Fp)
    alloc("w2", Hp)
    Rslab = _rup(cursor, SUB)

    slab = np.zeros((Rslab, SW), np.float32)
    for k in range(K):
        slab[off[f"wc{k}"]:off[f"wc{k}"] + Cin, :F] = wc[:, :, k].T      # (Cin, F)
    pool = np.zeros((B, R), np.float32)
    for b in range(B):
        pool[b, b * L: b * L + Lout] = 1.0 / Lout
    slab[off["pool"]:off["pool"] + B, :R] = pool
    slab[off["bc"], :F] = bc
    slab[off["b1"], :H] = b1
    slab[off["gamma"], :H] = gamma
    slab[off["beta"], :H] = beta
    slab[off["b2"], :P] = b2
    slab[off["w1"]:off["w1"] + F, :H] = w1
    slab[off["w2"]:off["w2"] + H, :P] = w2

    dims = dict(B=B, Cin=Cin, L=L, K=K, F=F, H=H, P=P, Lout=Lout, R=R,
                Fp=Fp, Hp=Hp, Pp=Pp, SW=SW, Rslab=Rslab, off=off)
    return jnp.asarray(slab), dims


def _make_kernel(d):
    B, Cin, K = d["B"], d["Cin"], d["K"]
    R, Fp, Hp, Pp = d["R"], d["Fp"], d["Hp"], d["Pp"]
    off = d["off"]

    def kernel(xt_ref, slab_ref, out_ref):
        xt = xt_ref[...]                                    # (B*L, Cin) f32

        # ---- Conv1d as K shifted, accumulated MXU matmuls ----
        # Row r of y corresponds to (b, l) with r = b*L + l.  Rows with
        # l >= Lout are cross-batch garbage and are zeroed out by `pool`.
        y = None
        for k in range(K):                                  # K static -> unrolled
            xk = xt[k:k + R, :]                             # (R, Cin) static slice
            wk = slab_ref[off[f"wc{k}"]:off[f"wc{k}"] + Cin, :Fp]
            t = jnp.dot(xk, wk, preferred_element_type=jnp.float32)
            y = t if y is None else y + t                   # (R, Fp)
        bc = slab_ref[off["bc"]:off["bc"] + 1, :Fp]
        y = jnp.maximum(y + bc, 0.0)                        # conv bias + ReLU

        # ---- global average pool over length (constant pool matrix) ----
        pool = slab_ref[off["pool"]:off["pool"] + B, :R]
        feat = jnp.dot(pool, y, preferred_element_type=jnp.float32)   # (B, Fp)

        # ---- projection MLPHead ----
        w1 = slab_ref[off["w1"]:off["w1"] + Fp, :Hp]
        b1 = slab_ref[off["b1"]:off["b1"] + 1, :Hp]
        h = jnp.dot(feat, w1, preferred_element_type=jnp.float32) + b1  # (B, Hp)

        # BatchNorm1d (training mode: biased batch statistics, eps=1e-5)
        mu = jnp.mean(h, axis=0, keepdims=True)
        var = jnp.mean((h - mu) ** 2, axis=0, keepdims=True)
        gamma = slab_ref[off["gamma"]:off["gamma"] + 1, :Hp]
        beta = slab_ref[off["beta"]:off["beta"] + 1, :Hp]
        hn = (h - mu) * jax.lax.rsqrt(var + 1e-5) * gamma + beta
        hn = jnp.maximum(hn, 0.0)

        w2 = slab_ref[off["w2"]:off["w2"] + Hp, :Pp]
        b2 = slab_ref[off["b2"]:off["b2"] + 1, :Pp]
        out_ref[...] = (jnp.dot(hn, w2, preferred_element_type=jnp.float32)
                        + b2).astype(out_ref.dtype)

    return kernel


def make_byol_forward(params, *, batch, in_ch, length):
    """Returns (forward, dims).  forward(x) -> (B, Ppad) with cols [:P] the
    projection and cols [P:] exactly zero (no post-call slice)."""
    slab, d = pack_params(params, batch=batch, in_ch=in_ch, length=length)
    kernel = _make_kernel(d)
    B, Cin, L, K = d["B"], d["Cin"], d["L"], d["K"]
    R, Fp, Hp, Pp = d["R"], d["Fp"], d["Hp"], d["Pp"]

    flops = (2 * R * Cin * Fp * K        # conv taps
             + 2 * B * R * Fp            # pooling matmul
             + 2 * B * Fp * Hp           # linear 1
             + 2 * B * Hp * Pp)          # linear 2
    bytes_accessed = 4 * (B * L * Cin + d["Rslab"] * d["SW"] + B * Pp)
    cost = pl.CostEstimate(flops=flops, transcendentals=Hp,
                           bytes_accessed=bytes_accessed)

    vmem = pl.BlockSpec(memory_space=pltpu.MemorySpace.VMEM)
    call = pl.pallas_call(
        kernel,
        out_shape=jax.ShapeDtypeStruct((B, Pp), jnp.float32),
        in_specs=[vmem, vmem],           # 2 input DMAs total: x view + weight slab
        out_specs=vmem,
        cost_estimate=cost,
    )

    @jax.jit
    def forward(x):
        # Single wrapper op on x: lane<->sublane swap so rows are (b, l) and the
        # channel/feature axes stay lane-dense through the whole kernel.
        xt = jnp.transpose(x, (0, 2, 1)).reshape(B * L, Cin).astype(jnp.float32)
        return call(xt, slab)

    return forward, d


def init_params(key, in_ch, feat_dim, kernel_size, mlp_hidden, proj_size):
    ks = jax.random.split(key, 6)
    s = 1.0 / (in_ch * kernel_size) ** 0.5
    wc = jax.random.uniform(ks[0], (feat_dim, in_ch, kernel_size), jnp.float32, -s, s)
    bc = jax.random.uniform(ks[1], (feat_dim,), jnp.float32, -s, s)
    s1 = 1.0 / feat_dim ** 0.5
    w1 = jax.random.uniform(ks[2], (feat_dim, mlp_hidden), jnp.float32, -s1, s1)
    b1 = jax.random.uniform(ks[3], (mlp_hidden,), jnp.float32, -s1, s1)
    gamma = jnp.ones((mlp_hidden,), jnp.float32)
    beta = jnp.zeros((mlp_hidden,), jnp.float32)
    s2 = 1.0 / mlp_hidden ** 0.5
    w2 = jax.random.uniform(ks[4], (mlp_hidden, proj_size), jnp.float32, -s2, s2)
    b2 = jax.random.uniform(ks[5], (proj_size,), jnp.float32, -s2, s2)
    return (wc, bc, w1, b1, gamma, beta, w2, b2)


def reference_forward(x, params):
    """Pure-JAX reference of the same math (sanity check)."""
    wc, bc, w1, b1, gamma, beta, w2, b2 = params
    K = wc.shape[-1]
    L = x.shape[-1]
    Lout = L - K + 1
    y = jnp.zeros((x.shape[0], wc.shape[0], Lout), jnp.float32)
    for k in range(K):
        y = y + jnp.einsum('fc,bcl->bfl', wc[:, :, k], x[:, :, k:k + Lout])
    y = jnp.maximum(y + bc[None, :, None], 0.0)
    feat = jnp.mean(y, axis=-1)
    h = feat @ w1 + b1
    mu = jnp.mean(h, axis=0, keepdims=True)
    var = jnp.mean((h - mu) ** 2, axis=0, keepdims=True)
    hn = (h - mu) * jax.lax.rsqrt(var + 1e-5) * gamma + beta
    hn = jnp.maximum(hn, 0.0)
    return hn @ w2 + b2


if __name__ == "__main__":
    # Small shapes consistent with the module's forward:
    #   x: (batch=2, in_channels=4, seq_len=16)
    #   backbone feature dim (== MLPHead in_channels) = 32
    #   mlp_hidden_size = 64, projection_size = 32, conv kernel = 3
    B, Cin, L = 2, 4, 16
    FEAT, HIDDEN, PROJ, K = 32, 64, 32, 3

    key = jax.random.PRNGKey(0)
    kx, kp = jax.random.split(key)
    x = jax.random.normal(kx, (B, Cin, L), jnp.float32)
    params = init_params(kp, Cin, FEAT, K, HIDDEN, PROJ)

    forward, dims = make_byol_forward(params, batch=B, in_ch=Cin, length=L)
    out = jax.block_until_ready(forward(x))            # (B, Ppad)

    ref = reference_forward(x, params)
    assert out.shape == (B, dims["Pp"])
    assert jnp.allclose(out[:, :PROJ], ref, atol=1e-3, rtol=1e-3), "mismatch vs reference"
    assert jnp.allclose(out[:, PROJ:], 0.0), "padding lanes must stay exactly zero"

    print("KERNEL_OK")
</pallas_src>

<mosaic_0001>
module attributes {stable_mosaic.version = 11 : i64} {
  func.func @kernel(%arg0: memref<32x4xf32, #tpu.memory_space<vmem>>, %arg1: memref<328x128xf32, #tpu.memory_space<vmem>>, %arg2: memref<2x128xf32, #tpu.memory_space<vmem>>) attributes {dimension_semantics = [], scalar_prefetch = 0 : i64, scratch_operands = 0 : i64, tpu.core_type = #tpu.core_type<tc>} {
    %c0 = arith.constant 0 : index
    %c0_0 = arith.constant 0 : index
    %0 = vector.load %arg0[%c0, %c0_0] : memref<32x4xf32, #tpu.memory_space<vmem>>, vector<32x4xf32>
    %1 = vector.extract_strided_slice %0 {offsets = [0, 0], sizes = [30, 4], strides = [1, 1]} : vector<32x4xf32> to vector<30x4xf32>
    %c0_1 = arith.constant 0 : index
    %c0_2 = arith.constant 0 : index
    %2 = vector.load %arg1[%c0_1, %c0_2] : memref<328x128xf32, #tpu.memory_space<vmem>>, vector<4x128xf32>
    %cst = arith.constant dense<0.000000e+00> : vector<30x128xf32>
    %3 = tpu.matmul %1, %2, %cst {dimension_numbers = #tpu.dot_dimension_numbers<[1], [0], [0], [1], [0, 0, 1, 1], [], []>} : vector<30x4xf32>, vector<4x128xf32>, vector<30x128xf32> -> vector<30x128xf32>
    %4 = vector.extract_strided_slice %0 {offsets = [1, 0], sizes = [30, 4], strides = [1, 1]} : vector<32x4xf32> to vector<30x4xf32>
    %c8 = arith.constant 8 : index
    %c0_3 = arith.constant 0 : index
    %5 = vector.load %arg1[%c8, %c0_3] : memref<328x128xf32, #tpu.memory_space<vmem>>, vector<4x128xf32>
    %cst_4 = arith.constant dense<0.000000e+00> : vector<30x128xf32>
    %6 = tpu.matmul %4, %5, %cst_4 {dimension_numbers = #tpu.dot_dimension_numbers<[1], [0], [0], [1], [0, 0, 1, 1], [], []>} : vector<30x4xf32>, vector<4x128xf32>, vector<30x128xf32> -> vector<30x128xf32>
    %7 = arith.addf %3, %6 : vector<30x128xf32>
    %8 = vector.extract_strided_slice %0 {offsets = [2, 0], sizes = [30, 4], strides = [1, 1]} : vector<32x4xf32> to vector<30x4xf32>
    %c16 = arith.constant 16 : index
    %c0_5 = arith.constant 0 : index
    %9 = vector.load %arg1[%c16, %c0_5] : memref<328x128xf32, #tpu.memory_space<vmem>>, vector<4x128xf32>
    %cst_6 = arith.constant dense<0.000000e+00> : vector<30x128xf32>
    %10 = tpu.matmul %8, %9, %cst_6 {dimension_numbers = #tpu.dot_dimension_numbers<[1], [0], [0], [1], [0, 0, 1, 1], [], []>} : vector<30x4xf32>, vector<4x128xf32>, vector<30x128xf32> -> vector<30x128xf32>
    %11 = arith.addf %7, %10 : vector<30x128xf32>
    %c32 = arith.constant 32 : index
    %c0_7 = arith.constant 0 : index
    %12 = vector.load %arg1[%c32, %c0_7] : memref<328x128xf32, #tpu.memory_space<vmem>>, vector<1x128xf32>
    %13 = vector.broadcast %12 : vector<1x128xf32> to vector<30x128xf32>
    %14 = arith.addf %11, %13 : vector<30x128xf32>
    %cst_8 = arith.constant 0.000000e+00 : f32
    %15 = vector.broadcast %cst_8 : f32 to vector<30x128xf32>
    %16 = arith.maximumf %14, %15 : vector<30x128xf32>
    %c24 = arith.constant 24 : index
    %c0_9 = arith.constant 0 : index
    %17 = vector.load %arg1[%c24, %c0_9] : memref<328x128xf32, #tpu.memory_space<vmem>>, vector<2x30xf32>
    %cst_10 = arith.constant dense<0.000000e+00> : vector<2x128xf32>
    %18 = tpu.matmul %17, %16, %cst_10 {dimension_numbers = #tpu.dot_dimension_numbers<[1], [0], [0], [1], [0, 0, 1, 1], [], []>} : vector<2x30xf32>, vector<30x128xf32>, vector<2x128xf32> -> vector<2x128xf32>
    %c72 = arith.constant 72 : index
    %c0_11 = arith.constant 0 : index
    %19 = vector.load %arg1[%c72, %c0_11] : memref<328x128xf32, #tpu.memory_space<vmem>>, vector<128x128xf32>
    %c40 = arith.constant 40 : index
    %c0_12 = arith.constant 0 : index
    %20 = vector.load %arg1[%c40, %c0_12] : memref<328x128xf32, #tpu.memory_space<vmem>>, vector<1x128xf32>
    %cst_13 = arith.constant dense<0.000000e+00> : vector<2x128xf32>
    %21 = tpu.matmul %18, %19, %cst_13 {dimension_numbers = #tpu.dot_dimension_numbers<[1], [0], [0], [1], [0, 0, 1, 1], [], []>} : vector<2x128xf32>, vector<128x128xf32>, vector<2x128xf32> -> vector<2x128xf32>
    %22 = vector.broadcast %20 : vector<1x128xf32> to vector<2x128xf32>
    %23 = arith.addf %21, %22 : vector<2x128xf32>
    %cst_14 = arith.constant dense<0.000000e+00> : vector<128xf32>
    %24 = vector.multi_reduction <add>, %23, %cst_14 [0] : vector<2x128xf32> to vector<128xf32>
    %25 = vector.shape_cast %24 : vector<128xf32> to vector<1x128xf32>
    %cst_15 = arith.constant 2.000000e+00 : f32
    %26 = vector.broadcast %cst_15 : f32 to vector<1x128xf32>
    %27 = arith.divf %25, %26 : vector<1x128xf32>
    %28 = vector.broadcast %27 : vector<1x128xf32> to vector<2x128xf32>
    %29 = arith.subf %23, %28 : vector<2x128xf32>
    %30 = arith.mulf %29, %29 : vector<2x128xf32>
    %cst_16 = arith.constant dense<0.000000e+00> : vector<128xf32>
    %31 = vector.multi_reduction <add>, %30, %cst_16 [0] : vector<2x128xf32> to vector<128xf32>
    %32 = vector.shape_cast %31 : vector<128xf32> to vector<1x128xf32>
    %cst_17 = arith.constant 2.000000e+00 : f32
    %33 = vector.broadcast %cst_17 : f32 to vector<1x128xf32>
    %34 = arith.divf %32, %33 : vector<1x128xf32>
    %c48 = arith.constant 48 : index
    %c0_18 = arith.constant 0 : index
    %35 = vector.load %arg1[%c48, %c0_18] : memref<328x128xf32, #tpu.memory_space<vmem>>, vector<1x128xf32>
    %c56 = arith.constant 56 : index
    %c0_19 = arith.constant 0 : index
    %36 = vector.load %arg1[%c56, %c0_19] : memref<328x128xf32, #tpu.memory_space<vmem>>, vector<1x128xf32>
    %37 = vector.broadcast %27 : vector<1x128xf32> to vector<2x128xf32>
    %38 = arith.subf %23, %37 : vector<2x128xf32>
    %cst_20 = arith.constant 9.99999974E-6 : f32
    %39 = vector.broadcast %cst_20 : f32 to vector<1x128xf32>
    %40 = arith.addf %34, %39 : vector<1x128xf32>
    %41 = math.rsqrt %40 : vector<1x128xf32>
    %42 = vector.broadcast %41 : vector<1x128xf32> to vector<2x128xf32>
    %43 = arith.mulf %38, %42 : vector<2x128xf32>
    %44 = vector.broadcast %35 : vector<1x128xf32> to vector<2x128xf32>
    %45 = arith.mulf %43, %44 : vector<2x128xf32>
    %46 = vector.broadcast %36 : vector<1x128xf32> to vector<2x128xf32>
    %47 = arith.addf %45, %46 : vector<2x128xf32>
    %cst_21 = arith.constant 0.000000e+00 : f32
    %48 = vector.broadcast %cst_21 : f32 to vector<2x128xf32>
    %49 = arith.maximumf %47, %48 : vector<2x128xf32>
    %c200 = arith.constant 200 : index
    %c0_22 = arith.constant 0 : index
    %50 = vector.load %arg1[%c200, %c0_22] : memref<328x128xf32, #tpu.memory_space<vmem>>, vector<128x128xf32>
    %c64 = arith.constant 64 : index
    %c0_23 = arith.constant 0 : index
    %51 = vector.load %arg1[%c64, %c0_23] : memref<328x128xf32, #tpu.memory_space<vmem>>, vector<1x128xf32>
    %cst_24 = arith.constant dense<0.000000e+00> : vector<2x128xf32>
    %52 = tpu.matmul %49, %50, %cst_24 {dimension_numbers = #tpu.dot_dimension_numbers<[1], [0], [0], [1], [0, 0, 1, 1], [], []>} : vector<2x128xf32>, vector<128x128xf32>, vector<2x128xf32> -> vector<2x128xf32>
    %53 = vector.broadcast %51 : vector<1x128xf32> to vector<2x128xf32>
    %54 = arith.addf %52, %53 : vector<2x128xf32>
    %c0_25 = arith.constant 0 : index
    %c0_26 = arith.constant 0 : index
    %55 = vector.load %arg2[%c0_25, %c0_26] : memref<2x128xf32, #tpu.memory_space<vmem>>, vector<2x128xf32>
    tpu.vector_store %arg2[%c0_25, %c0_26], %54 {strides = array<i32>} : memref<2x128xf32, #tpu.memory_space<vmem>>, vector<2x128xf32>,
    return
  }
}

</mosaic_0001>

<bundles_post_ra>
// kernel: forward.1
= control target key start
LH: loop header
LB: loop body
LE: loop exit
PB: predicated region body
PF: predicated region fallthrough
CT: control target
= control target key end

     0   :  { %7 = vsyncpa [#allocation3], 0  ;;  %s1079_s0 = inlined_call_operand.vmem [shape: f32[32,4], index: 0, kind: input, shape index: {}]   ;;  %s1080_s1 = inlined_call_operand.hbm [shape: f32[328,128], index: 1, kind: input, shape index: {}]   ;;  %s1081_s2 = inlined_call_operand.hbm [shape: f32[2,128], index: 2, kind: output, shape index: {}]  }
   0x1   :  { %8 = vsyncpa [#allocation4], 0  ;;  %s974_s9 = smov [#allocation2]   ;;  %s926_s13 = scalar_lea.hbm %s1080_s1, 5248 }
   0x2   :  { %s16_s10 = sshll.u32 %s974_s9, 4  ;;  %p927_p0 = scmp.ne.s32.totalorder %s1080_s1, %s926_s13  ;;  %s17_s10 = int_to_ptr.vmem [resolvable:$true] %s16_s10 }
   0x3   :  { %p930_p1 = scmp.lt.u32.totalorder %s926_s13, %s1080_s1 }
   0x5   :  { %p932_p2 = pnand %p930_p1, %p927_p0 }
   0x7   :  { %935 = shalt.err (!%p932_p2)
}
   0x8   :  { %s936_s18 = scalar_lea.vmem %s17_s10, 5248  ;;  %p941_p4 = scmp.lt.s32.totalorder %s17_s10, %s17_s10 }
   0x9   :  { %p937_p3 = scmp.ne.s32.totalorder %s17_s10, %s936_s18  ;;  %p942_p5 = scmp.lt.s32.totalorder %s936_s18, %s936_s18 }
   0xb   :  { %p943_p6 = por %p942_p5, %p941_p4 }
   0xd   :  { %p944_p7 = pnand %p943_p6, %p937_p3 }
   0xf   :  { %947 = shalt.err (!%p944_p7)
}
  0x10   :  { %s975_s19 = smov 128   ;;  %s976_s20 = smov 8  }
  0x11   :  { %22 = dma.hbm_to_vmem [thread:$0]  %s1080_s1, 5248, %s17_s10, [#allocation3], %s975_s19, %s975_s19, %s976_s20  }
  0x12   :  { %970 = dma.done.wait [#allocation3], 5248  }
  0x13   :  { %971 = vsyncadd [#allocation3], 4294962048  ;;  %vm53_vm0 = vcmask 1043456   ;;  %vm44_vm1 = vcmask 31744   ;;  %v30_v0 = vld [vmem:[#allocation2] sm:$0xf] }
  0x14   :  { %v26_v1 = vld [vmem:[%s1079_s0] sm:$0xff]  ;;  %v27_v2 = vld [vmem:[%s1079_s0 + $0x8] sm:$0xff]  ;;  %vm36_vm2 = vcmask 1046528   ;;  %756 = vmatprep.subr.msk.mxu0 %vm53_vm0, %v30_v0  ;;  %v238_v6 = vld [vmem:[#allocation2 + $0x10] sm:$0xf]  ;;  %vm239_vm3 = vcmask 1045504  }
  0x15   :  { %v37_v3 = vrot.slane %v26_v1, 1  ;;  %758 = vmatprep.mubr.msk.f32.mxu0 %vm44_vm1, %v26_v1  ;;  %v240_v4 = vrot.slane %v26_v1, 2  ;;  %v241_v5 = vrot.slane %v27_v2, 2  ;;  %v28_v7 = vld [vmem:[%s1079_s0 + $0x10] sm:$0xff]  ;;  %757 = vmatpush3.msk.msra.mxu0 %vm53_vm0, %v30_v0  ;;  %v29_v9 = vld [vmem:[%s1079_s0 + $0x18] sm:$0xff]  ;;  %v38_v11 = vrot.slane %v27_v2, 1 }
  0x16   :  { %v40_v8 = vrot.slane %v28_v7, 1  ;;  %v31_v10 = vld [vmem:[#allocation2 + $0x8] sm:$0xf]  ;;  %759 = vmatmul.mubr.msk.f32.vlgmr.msra.gmra.mrb[0].mxu0 %vm44_vm1, %v27_v2  ;;  %764 = vmatprep.subr.msk.mxu0 %vm53_vm0, %v238_v6  ;;  %v42_v12 = vrot.slane %v29_v9, 1  ;;  %v243_v13 = vrot.slane %v28_v7, 2  ;;  %v245_v16 = vrot.slane %v29_v9, 2 }
  0x17   :  { %765 = vmatpush3.msk.msra.mxu0 %vm53_vm0, %v238_v6  ;;  %761 = vmatprep.mubr.msk.f32.mxu0 %vm44_vm1, %v28_v7  ;;  %v39_v14 = vsel %vm36_vm2, %v37_v3, %v38_v11  ;;  %v242_v17 = vsel %vm239_vm3, %v240_v4, %v241_v5  ;;  %v977_v21 = vmov 0.0|0.0   ;;  %vm978_vm4 = vmmov 0   ;;  %v687_v26 = vld [vmem:[#allocation2 + $0x20] ss:$0 sm:$0xff]  ;;  %v438_v45 = vld [vmem:[#allocation2 + $0x48] sm:$0xff]  ;;  %v439_v46 = vld [vmem:[#allocation2 + $0x50] sm:$0xff] }
  0x18   :  { %v41_v15 = vsel %vm36_vm2, %v38_v11, %v40_v8  ;;  %748 = vmatprep.subr.msk.mxu1 %vm53_vm0, %v31_v10  ;;  %750 = vmatprep.mubr.msk.f32.mxu1 %vm44_vm1, %v39_v14  ;;  %v43_v18 = vsel %vm36_vm2, %v40_v8, %v42_v12  ;;  %v244_v19 = vsel %vm239_vm3, %v241_v5, %v243_v13  ;;  %v979_v22 = vmov 0.0   ;;  %v360_v48 = vld [vmem:[#allocation2 + $0x18] sm:$0x3]  ;;  %v441_v51 = vld [vmem:[#allocation2 + $0x60] sm:$0xff]  ;;  %v442_v53 = vld [vmem:[#allocation2 + $0x68] sm:$0xff]  ;;  %s981_s0 = smov [#allocation5]  }
  0x19   :  { %749 = vmatpush3.msk.msra.mxu1 %vm53_vm0, %v31_v10  ;;  %v246_v20 = vsel %vm239_vm3, %v243_v13, %v245_v16  ;;  %884 = vmatprep.subr.bf16.mxu0 %v977_v21  ;;  %vm980_vm5 = vmmov 1   ;;  %vm361_vm7 = vcmask 244736   ;;  %v861_v49 = vpack.c.bf16 %v439_v46, %v438_v45  ;;  %v440_v50 = vld [vmem:[#allocation2 + $0x58] sm:$0xff]  ;;  %v443_v54 = vld [vmem:[#allocation2 + $0x70] sm:$0xff]  ;;  %v445_v57 = vld [vmem:[#allocation2 + $0x80] sm:$0xff]  ;;  %s663_s30 = sshll.u32 %s981_s0, 4  ;;  %s664_s30 = int_to_ptr.vmem [resolvable:$true] %s663_s30 }
  0x1a   :  { %762 = vmatmul.mubr.msk.f32.gmra.mrb[2].mxu0 %vm44_vm1, %v29_v9  ;;  %751 = vmatmul.mubr.msk.f32.vlgmr.msra.gmra.mrb[0].mxu1 %vm44_vm1, %v41_v15  ;;  %vm858_vm6 = vmpackc.low %vm239_vm3, %vm980_vm5  ;;  %v864_v52 = vpack.c.bf16 %v441_v51, %v440_v50  ;;  %v867_v55 = vpack.c.bf16 %v443_v54, %v442_v53  ;;  %v444_v56 = vld [vmem:[#allocation2 + $0x78] sm:$0xff]  ;;  %v446_v59 = vld [vmem:[#allocation2 + $0x88] sm:$0xff]  ;;  %vm529_vm8 = vcmask 1041408   ;;  %s948_s3 = scalar_lea.vmem %s664_s30, 32  ;;  %p953_p9 = scmp.lt.s32.totalorder %s664_s30, %s664_s30 }
  0x1b   :  { %766 = vmatprep.mubr.msk.f32.mxu0 %vm44_vm1, %v242_v17  ;;  %753 = vmatprep.mubr.msk.f32.mxu1 %vm44_vm1, %v43_v18  ;;  %v870_v58 = vpack.c.bf16 %v445_v57, %v444_v56  ;;  %v447_v60 = vld [vmem:[#allocation2 + $0x90] sm:$0xff]  ;;  %v448_v62 = vld [vmem:[#allocation2 + $0x98] sm:$0xff]  ;;  %v449_v63 = vld [vmem:[#allocation2 + $0xa0] sm:$0xff]  ;;  %p949_p8 = scmp.ne.s32.totalorder %s664_s30, %s948_s3  ;;  %p954_p10 = scmp.lt.s32.totalorder %s948_s3, %s948_s3 }
  0x1c   :  { %853 = vmatprep.subr.bf16.mxu1 %v977_v21  ;;  %v873_v61 = vpack.c.bf16 %v447_v60, %v446_v59  ;;  %v876_v0 = vpack.c.bf16 %v449_v63, %v448_v62  ;;  %v450_v1 = vld [vmem:[#allocation2 + $0xa8] sm:$0xff]  ;;  %v451_v2 = vld [vmem:[#allocation2 + $0xb0] sm:$0xff]  ;;  %v452_v4 = vld [vmem:[#allocation2 + $0xb8] sm:$0xff] }
  0x1d   :  { %v879_v3 = vpack.c.bf16 %v451_v2, %v450_v1  ;;  %v453_v5 = vld [vmem:[#allocation2 + $0xc0] sm:$0xff]  ;;  %v565_v9 = vld [vmem:[#allocation2 + $0xc8] sm:$0xff]  ;;  %v566_v10 = vld [vmem:[#allocation2 + $0xd0] sm:$0xff]  ;;  %p955_p11 = por %p954_p10, %p953_p9 }
  0x1e   :  { %767 = vmatmul.mubr.msk.f32.vlgmr.msra.gmra.mrb[0].mxu0 %vm44_vm1, %v244_v19  ;;  %754 = vmatmul.mubr.msk.f32.gmra.mrb[2].mxu1 %vm44_vm1, %v42_v12  ;;  %v882_v6 = vpack.c.bf16 %v453_v5, %v452_v4  ;;  %v885_v11 = vpack.c.bf16 %v566_v10, %v565_v9  ;;  %v567_v12 = vld [vmem:[#allocation2 + $0xd8] sm:$0xff]  ;;  %v568_v13 = vld [vmem:[#allocation2 + $0xe0] sm:$0xff]  ;;  %v569_v15 = vld [vmem:[#allocation2 + $0xe8] sm:$0xff] }
  0x1f   :  { %769 = vmatprep.mubr.msk.f32.mxu0 %vm44_vm1, %v246_v20  ;;  %780 = vmatprep.mubr.msk.f32.mxu1 %vm978_vm4, %v979_v22  ;;  %v888_v14 = vpack.c.bf16 %v568_v13, %v567_v12  ;;  %v571_v18 = vld [vmem:[#allocation2 + $0xf8] sm:$0xff]  ;;  %v572_v19 = vld [vmem:[#allocation2 + $0x100] sm:$0xff]  ;;  %v691_v57 = vld [vmem:[#allocation2 + $0x30] ss:$0 sm:$0xff]  ;;  %p956_p12 = pnand %p955_p11, %p949_p8 }
  0x20   :  { %886 = vmatpush3.bf16.msra.mxu0 %v885_v11  ;;  %v894_v20 = vpack.c.bf16 %v572_v19, %v571_v18  ;;  %v692_v59 = vld [vmem:[#allocation2 + $0x38] ss:$0 sm:$0xff]  ;;  %v693_v63 = vld [vmem:[#allocation2 + $0x40] ss:$0 sm:$0xff] }
  0x21   :  { %887 = vmatprep.subr.bf16.mxu0 %v977_v21 }
  0x22   :  { %770 = vmatmul.mubr.msk.f32.gmra.mrb[2].mxu0 %vm44_vm1, %v245_v16  ;;  %v570_v16 = vld [vmem:[#allocation2 + $0xf0] sm:$0xff] }
  0x23   :  { %850 = vmatprep.mubr.msk.f32.mxu0 %vm978_vm4, %v979_v22  ;;  %v891_v17 = vpack.c.bf16 %v570_v16, %v569_v15 }
  0x24   :  { %889 = vmatpush3.bf16.msra.mxu0 %v888_v14 }
  0x25   :  { %890 = vmatprep.subr.bf16.mxu0 %v977_v21 }
  0x28   :  { %892 = vmatpush3.bf16.msra.mxu0 %v891_v17 }
  0x29   :  { %893 = vmatprep.subr.bf16.mxu0 %v977_v21 }
  0x2c   :  { %895 = vmatpush3.bf16.msra.mxu0 %v894_v20 }
  0x2d   :  { %896 = vmatprep.subr.bf16.mxu0 %v977_v21 }
  0xed   :  { %v752_v23 = vpop.f32.mrb[0].mxu1 }
  0xee   :  { %v123_v24 = vpop.f32.mrb[1].mxu1 }
  0xf1   :  { %v768_v25 = vpop.f32.mrb[0].mxu0  ;;  %v755_v27 = vpop.f32.mrb[2].mxu1 }
  0xf2   :  { %v908_v28 = vadd.f32 %v768_v25, %v752_v23  ;;  %v324_v29 = vpop.f32.mrb[1].mxu0  ;;  %v133_v30 = vpop.f32.mrb[3].mxu1  ;;  %v574_v23 = vld [vmem:[#allocation2 + $0x110] sm:$0xff]  ;;  %v575_v25 = vld [vmem:[#allocation2 + $0x118] sm:$0xff] }
  0xf3   :  { %v909_v31 = vadd.f32 %v324_v29, %v123_v24  ;;  %v578_v29 = vld [vmem:[#allocation2 + $0x130] sm:$0xff] }
  0xf4   :  { %v353_v32 = vadd.f32 %v908_v28, %v687_v26  ;;  %v577_v28 = vld [vmem:[#allocation2 + $0x128] sm:$0xff] }
  0xf5   :  { %v352_v33 = vadd.f32 %v909_v31, %v687_v26  ;;  %v771_v34 = vpop.f32.mrb[2].mxu0  ;;  %v579_v31 = vld [vmem:[#allocation2 + $0x138] sm:$0xff] }
  0xf6   :  { %v357_v35 = vmax.f32 %v353_v32, 0.0  ;;  %v910_v36 = vadd.f32 %v771_v34, %v755_v27  ;;  %v334_v37 = vpop.f32.mrb[3].mxu0  ;;  %v580_v32 = vld [vmem:[#allocation2 + $0x140] sm:$0xff]  ;;  %v690_v34 = vld [vmem:[#allocation2 + $0x28] ss:$0 sm:$0xff] }
  0xf7   :  { %v356_v38 = vmax.f32 %v352_v33, 0.0  ;;  %v911_v39 = vadd.f32 %v334_v37, %v133_v30  ;;  %v903_v30 = vpack.c.bf16 %v578_v29, %v577_v28  ;;  %v906_v33 = vpack.c.bf16 %v580_v32, %v579_v31 }
  0xf8   :  { %v355_v40 = vadd.f32 %v910_v36, %v687_v26 }
  0xf9   :  { %v854_v41 = vpack.c.bf16 %v357_v35, %v356_v38  ;;  %v354_v42 = vadd.f32 %v911_v39, %v687_v26  ;;  %v576_v26 = vld [vmem:[#allocation2 + $0x120] sm:$0xff] }
  0xfa   :  { %v359_v43 = vmax.f32 %v355_v40, 0.0  ;;  %v900_v27 = vpack.c.bf16 %v576_v26, %v575_v25 }
  0xfb   :  { %v358_v44 = vmax.f32 %v354_v42, 0.0  ;;  %855 = vmatpush3.bf16.msra.mxu1 %v854_v41 }
  0xfc   :  { %856 = vmatprep.subr.bf16.mxu1 %v977_v21 }
  0xfd   :  { %v857_v47 = vpack.c.bf16 %v359_v43, %v358_v44 }
  0xff   :  { %859 = vmatpush3.bf16.msk.msra.mxu1 %vm858_vm6, %v857_v47 }
 0x100   :  { %860 = vmatprep.subr.bf16.mxu1 %v977_v21 }
 0x102   :  { %781 = vmatmul.mubr.msk.f32.vlgmr.msra.gmra.mrb[4].mxu1 %vm361_vm7, %v360_v48 }
 0x103   :  { %862 = vmatpush3.bf16.msra.mxu1 %v861_v49  ;;  %815 = vmatprep.mubr.msk.f32.mxu1 %vm978_vm4, %v979_v22  ;;  %v573_v22 = vld [vmem:[#allocation2 + $0x108] sm:$0xff] }
 0x104   :  { %863 = vmatprep.subr.bf16.mxu1 %v977_v21  ;;  %v897_v24 = vpack.c.bf16 %v574_v23, %v573_v22 }
 0x106   :  { %898 = vmatpush3.bf16.msra.mxu0 %v897_v24 }
 0x107   :  { %865 = vmatpush3.bf16.msra.mxu1 %v864_v52  ;;  %899 = vmatprep.subr.bf16.mxu0 %v977_v21 }
 0x108   :  { %866 = vmatprep.subr.bf16.mxu1 %v977_v21 }
 0x10a   :  { %901 = vmatpush3.bf16.msra.mxu0 %v900_v27 }
 0x10b   :  { %868 = vmatpush3.bf16.msra.mxu1 %v867_v55  ;;  %902 = vmatprep.subr.bf16.mxu0 %v977_v21 }
 0x10c   :  { %869 = vmatprep.subr.bf16.mxu1 %v977_v21 }
 0x10e   :  { %904 = vmatpush3.bf16.msra.mxu0 %v903_v30 }
 0x10f   :  { %871 = vmatpush3.bf16.msra.mxu1 %v870_v58  ;;  %905 = vmatprep.subr.bf16.mxu0 %v977_v21 }
 0x110   :  { %872 = vmatprep.subr.bf16.mxu1 %v977_v21 }
 0x112   :  { %907 = vmatpush3.bf16.msra.mxu0 %v906_v33 }
 0x113   :  { %874 = vmatpush3.bf16.msra.mxu1 %v873_v61 }
 0x114   :  { %875 = vmatprep.subr.bf16.mxu1 %v977_v21 }
 0x117   :  { %877 = vmatpush3.bf16.msra.mxu1 %v876_v0 }
 0x118   :  { %878 = vmatprep.subr.bf16.mxu1 %v977_v21 }
 0x11b   :  { %880 = vmatpush3.bf16.msra.mxu1 %v879_v3 }
 0x11c   :  { %881 = vmatprep.subr.bf16.mxu1 %v977_v21 }
 0x11f   :  { %883 = vmatpush3.bf16.msra.mxu1 %v882_v6 }
 0x1d5   :  { %v434_v7 = vpop.f32.mrb[4].mxu1 }
 0x1d6   :  { %v782_v8 = vpop.f32.mrb[5].mxu1  ;;  %816 = vmatmul.mubr.f32.vlgmr.msra.gmra.mrb[6].mxu1 %v434_v7 }
 0x2a9   :  { %v525_v35 = vpop.f32.mrb[6].mxu1 }
 0x2aa   :  { %v526_v36 = vadd.f32 %v690_v34, %v525_v35  ;;  %v817_v37 = vpop.f32.mrb[7].mxu1 }
 0x2ac   :  { %v530_v38 = vsel %vm529_vm8, %v526_v36, 0.0 }
 0x2ad   :  { %v531_v39 = vrot.slane %v530_v38, 4 }
 0x2af   :  { %v532_v40 = vadd.f32 %v531_v39, %v530_v38 }
 0x2b1   :  { %v533_v41 = vrot.slane %v532_v40, 2 }
 0x2b3   :  { %v534_v42 = vadd.f32 %v533_v41, %v532_v40 }
 0x2b5   :  { %v535_v43 = vrot.slane %v534_v42, 1 }
 0x2b7   :  { %v536_v44 = vadd.f32 %v535_v43, %v534_v42 }
 0x2b9   :  { %v538_v45 = vmul.f32 0.5, %v536_v44 }
 0x2bb   :  { %v539_v46 = vsub.f32 %v526_v36, %v538_v45 }
 0x2bd   :  { %v540_v47 = vmul.f32 %v539_v46, %v539_v46 }
 0x2bf   :  { %v541_v21 = vsel %vm529_vm8, %v540_v47, 0.0 }
 0x2c0   :  { %v542_v48 = vrot.slane %v541_v21, 4 }
 0x2c2   :  { %v543_v49 = vadd.f32 %v542_v48, %v541_v21 }
 0x2c4   :  { %v544_v50 = vrot.slane %v543_v49, 2 }
 0x2c6   :  { %v545_v51 = vadd.f32 %v544_v50, %v543_v49 }
 0x2c8   :  { %v546_v52 = vrot.slane %v545_v51, 1 }
 0x2ca   :  { %v547_v53 = vadd.f32 %v546_v52, %v545_v51 }
 0x2cc   :  { %v548_v54 = vmul.f32 0.5, %v547_v53 }
 0x2ce   :  { %v551_v55 = vadd.f32 1e-05, %v548_v54 }
 0x2d0   :  { %924 = vrsqrt.f32 %v551_v55 }
 0x2da   :  { %v925_v56 = vpop.eup %924 }
 0x2db   :  { %v553_v58 = vmul.f32 %v925_v56, %v539_v46 }
 0x2dd   :  { %v558_v60 = vmul.f32 %v691_v57, %v553_v58 }
 0x2df   :  { %v563_v61 = vadd.f32 %v692_v59, %v558_v60 }
 0x2e1   :  { %v564_v62 = vmax.f32 %v563_v61, 0.0 }
 0x2e3   :  { %851 = vmatmul.mubr.f32.vlgmr.msra.gmra.mrb[4].mxu0 %v564_v62 }
 0x3b6   :  { %v652_v0 = vpop.f32.mrb[4].mxu0 }
 0x3b7   :  { %v653_v1 = vadd.f32 %v693_v63, %v652_v0  ;;  %v852_v2 = vpop.f32.mrb[5].mxu0 }
 0x3b9   :  { %656 = vst [vmem:[#allocation5] sm:$0x3] %v653_v1 }
 0x3ba   :  { %959 = shalt.err (!%p956_p12)
}
 0x3bb   :  { %s960_s6 = scalar_lea.hbm %s1081_s2, 32 }
 0x3bc   :  { %p961_p13 = scmp.ne.s32.totalorder %s1081_s2, %s960_s6  ;;  %p964_p0 = scmp.lt.u32.totalorder %s960_s6, %s1081_s2 }
 0x3be   :  { %p966_p1 = pnand %p964_p0, %p961_p13 }
 0x3c0   :  { %969 = shalt.err (!%p966_p1)
}
 0x3c1   :  { %666 = dma.vmem_to_hbm [thread:$0]  %s664_s30, 32, %s1081_s2, [#allocation4]  }
 0x3c2   :  { %972 = dma.done.wait [#allocation4], 32  }
 0x3c3   :  { %973 = vsyncadd [#allocation4], 4294967264 }
 0x3c4   :  { %670 = vsyncpa [#allocation3], 1 }
 0x3c5   :  { %671 = vsyncpa [#allocation4], 1 }

</bundles_post_ra>
